<compile_context>
chip_gen: v7x
topology: tpu7x:2x2x1
jax: 0.10.0
libtpu: 0.0.40
codegen_flags: <defaults>
</compile_context>

<pallas_src>
import functools

import numpy as np
import jax
import jax.numpy as jnp
from jax import lax
from jax.experimental import pallas as pl
from jax.experimental.pallas import tpu as pltpu


_TN = 256    # output tile width (lanes): multiple of 128 -> lane-dense, unmasked stores
_BLK = 512   # input block width (lanes): two adjacent blocks always cover the
             # ceil((_TN - 1) * speed) + 2 source span needed by one output tile


def _peak_kernel(x_ref, peak_ref):
    """max |x| over the whole waveform (runs once; an utterance easily fits VMEM)."""
    peak_ref[...] = jnp.max(jnp.abs(x_ref[...]), keepdims=True)


def _resample_kernel(blk_ref, x_lo_ref, x_hi_ref, inv_ref, o_ref, *, speed, t_in):
    """One lane-dense output tile of: y = (1/peak) * linear_resample(x, speed).

    blk_ref  : (n_tiles,) int32 SMEM  scalar-prefetched source block index per tile
    x_lo_ref : (C, _BLK)  VMEM        source block  blk[j]
    x_hi_ref : (C, _BLK)  VMEM        source block  blk[j] + 1
    inv_ref  : (1, 1) f32 SMEM        1 / max|x|   (hoisted 'gain -n' normalization)
    o_ref    : (C, _TN)   VMEM        output tile j
    """
    j = pl.program_id(0)
    base = blk_ref[j] * _BLK                                    # window start (elements)

    # fractional source position of every output column in this tile (exact in f32)
    col = lax.broadcasted_iota(jnp.int32, (1, _TN), 1).astype(jnp.float32)
    pos = (col + (j * _TN).astype(jnp.float32)) * jnp.float32(speed)
    pos = jnp.minimum(pos, jnp.float32(t_in - 1))               # only affects masked tail cols
    pos_local = pos - base.astype(jnp.float32)                  # in [0, 2 * _BLK)

    # linear-interp ("tent") weights built in-kernel from iota: window row r gets
    # max(0, 1 - |r - pos|)  ==  (1 - frac) at floor(pos) and frac at floor(pos) + 1.
    row = lax.broadcasted_iota(jnp.int32, (_BLK, _TN), 0).astype(jnp.float32)
    w_lo = jnp.maximum(0.0, 1.0 - jnp.abs(row - pos_local))
    w_hi = jnp.maximum(0.0, 1.0 - jnp.abs(row + jnp.float32(_BLK) - pos_local))

    # 2-tap gather expressed as a small banded one-hot contraction: no dynamic-gather
    # primitive needed, no HBM-resident resampling matrix.  Work per tile is
    # O(_BLK * _TN); total work is O(T), not O(T^2).
    y = jnp.dot(x_lo_ref[...], w_lo, preferred_element_type=jnp.float32)
    y = y + jnp.dot(x_hi_ref[...], w_hi, preferred_element_type=jnp.float32)

    # 'gain -n': scale only the small (C, _TN) output tile by the hoisted 1/peak.
    o_ref[...] = (y * inv_ref[0, 0]).astype(o_ref.dtype)


def sox_speed_gain_pallas(x: jax.Array, speed: float) -> jax.Array:
    """sox ['gain','-n'] + ['speed', speed] on a channels-first waveform (C, T)."""
    x = x.astype(jnp.float32)
    c, t_in = x.shape
    t_out = int(round(t_in / speed))
    n_tiles = -(-t_out // _TN)
    assert _BLK >= int(np.ceil((_TN - 1) * speed)) + 2, "speed too large for _BLK window"

    # Per-output-tile source block index (host side: `speed` is host RNG, static per call).
    starts = np.floor(np.arange(n_tiles, dtype=np.float64) * _TN * speed).astype(np.int64)
    blk_idx = (starts // _BLK).astype(np.int32)

    # Pad x with zeros so blocks [blk, blk + 1] are always fully in bounds.  Padded samples
    # are never selected: source positions are clamped to t_in - 1 in-kernel.
    t_pad = (int(blk_idx.max()) + 2) * _BLK
    xp = jnp.pad(x, ((0, 0), (0, max(0, t_pad - t_in))))

    # Pass 1: global peak for 'gain -n' (tiny one-shot kernel -- hoisted out of the tile loop).
    peak = pl.pallas_call(
        _peak_kernel,
        out_shape=jax.ShapeDtypeStruct((1, 1), jnp.float32),
    )(x)
    inv = jnp.where(peak > 0.0, 1.0 / peak, 1.0).astype(jnp.float32)

    kernel = functools.partial(_resample_kernel, speed=float(speed), t_in=t_in)
    cost = pl.CostEstimate(
        flops=2 * 2 * c * _BLK * _TN * n_tiles,
        transcendentals=0,
        bytes_accessed=4 * c * (2 * t_pad + t_out),
    )

    return pl.pallas_call(
        kernel,
        out_shape=jax.ShapeDtypeStruct((c, t_out), jnp.float32),
        grid_spec=pltpu.PrefetchScalarGridSpec(
            num_scalar_prefetch=1,                   # blk_idx -> SMEM, drives the index_maps
            grid=(n_tiles,),
            in_specs=[
                pl.BlockSpec((c, _BLK), lambda j, blk: (0, blk[j])),      # low source block
                pl.BlockSpec((c, _BLK), lambda j, blk: (0, blk[j] + 1)),  # high source block
                pl.BlockSpec(memory_space=pltpu.MemorySpace.SMEM),        # inv (1,1) scalar
            ],
            out_specs=pl.BlockSpec((c, _TN), lambda j, blk: (0, j)),
        ),
        compiler_params=pltpu.CompilerParams(
            dimension_semantics=("parallel",),       # independent output tiles (megacore OK)
            vmem_limit_bytes=32 * 1024 * 1024,       # ~2-3 MiB/step footprint: fits v5e/v6e/v7x
        ),
        cost_estimate=cost,
    )(jnp.asarray(blk_idx), xp, xp, inv)


class SoxAugment:
    """JAX/Pallas port of deepspeech_pytorch SoxAugment (no learnable parameters)."""

    def __init__(self, rate, sample_rate=16000, speed_range: float = 0.2,
                 pitch_range: int = 400):
        self.rate = rate
        self.sample_rate = sample_rate
        self.speed_range = speed_range
        self.pitch_range = pitch_range
        self.rng = np.random.RandomState(42)        # same seed as the torch module
        self._prob_rng = np.random.RandomState(0)   # stand-in for torch.rand(1,1).item()

    def __call__(self, x: jax.Array) -> jax.Array:
        probability = float(self._prob_rng.rand())  # host RNG branch, as in the original
        if self.rate > probability:
            return self.augment(x)
        return x

    def augment(self, x: jax.Array) -> jax.Array:
        speed = float(self.rng.uniform(1 - self.speed_range, 1 + self.speed_range))
        pitch = int(self.rng.uniform(-self.pitch_range, self.pitch_range))
        del pitch  # TODO(synk): sox 'pitch' (WSOLA/phase-vocoder) has no clean Pallas equivalent; omitted.
        return sox_speed_gain_pallas(x, speed)


def _reference(x: np.ndarray, speed: float) -> np.ndarray:
    """numpy reference: 'gain -n' (peak normalize) + linear-interp resample by `speed`."""
    x = np.asarray(x, dtype=np.float32)
    peak = np.max(np.abs(x))
    inv = np.float32(1.0) / peak if peak > 0 else np.float32(1.0)
    c, t_in = x.shape
    t_out = int(round(t_in / speed))
    pos = np.arange(t_out, dtype=np.float32) * np.float32(speed)  # match kernel f32 math
    i0 = np.clip(np.floor(pos).astype(np.int64), 0, t_in - 1)
    i1 = np.clip(i0 + 1, 0, t_in - 1)
    frac = (pos - i0.astype(np.float32)).astype(np.float32)
    y = x[:, i0] * (1.0 - frac)[None, :] + x[:, i1] * frac[None, :]
    return (y * inv).astype(np.float32)


if __name__ == "__main__":
    key = jax.random.PRNGKey(0)
    C, T = 2, 2048                                  # small channels-first waveform (C, T)
    x = 0.3 * jax.random.normal(key, (C, T), dtype=jnp.float32)

    aug = SoxAugment(rate=1.0)                      # rate=1.0 -> always takes the augment path
    y = jax.block_until_ready(aug(x))

    # forward semantics checks against a pure-numpy reference
    speed = float(np.random.RandomState(42).uniform(0.8, 1.2))   # same first draw as aug.rng
    t_out = int(round(T / speed))
    assert y.shape == (C, t_out), (y.shape, (C, t_out))
    y_ref = _reference(np.asarray(x), speed)
    err = float(np.max(np.abs(np.asarray(y) - y_ref)))
    # tolerance leaves room for MXU rounding of the f32 one-hot contraction
    assert err < 2e-2, f"max abs error vs reference: {err}"

    # rate=0.0 -> the pass-through branch returns the input untouched
    y_pass = SoxAugment(rate=0.0)(x)
    assert y_pass is x

    print("KERNEL_OK")
</pallas_src>

<mosaic_0001>
module attributes {stable_mosaic.version = 11 : i64} {
  func.func @_peak_kernel(%arg0: memref<2x2048xf32, #tpu.memory_space<vmem>>, %arg1: memref<1x1xf32, #tpu.memory_space<vmem>>) attributes {dimension_semantics = [], scalar_prefetch = 0 : i64, scratch_operands = 0 : i64, tpu.core_type = #tpu.core_type<tc>} {
    %c0 = arith.constant 0 : index
    %c0_0 = arith.constant 0 : index
    %0 = vector.load %arg0[%c0, %c0_0] : memref<2x2048xf32, #tpu.memory_space<vmem>>, vector<2x2048xf32>
    %1 = math.absf %0 : vector<2x2048xf32>
    %2 = vector.shape_cast %1 : vector<2x2048xf32> to vector<1x2x2048xf32>
    %cst = arith.constant dense<0xFF800000> : vector<1xf32>
    %3 = vector.multi_reduction <maximumf>, %2, %cst [1, 2] : vector<1x2x2048xf32> to vector<1xf32>
    %4 = vector.shape_cast %3 : vector<1xf32> to vector<1x1x1xf32>
    %5 = vector.extract %4[0, 0, 0] : f32 from vector<1x1x1xf32>
    %6 = vector.broadcast %5 : f32 to vector<1x1xf32>
    %c0_1 = arith.constant 0 : index
    %c0_2 = arith.constant 0 : index
    %7 = vector.load %arg1[%c0_1, %c0_2] : memref<1x1xf32, #tpu.memory_space<vmem>>, vector<1x1xf32>
    tpu.vector_store %arg1[%c0_1, %c0_2], %6 {strides = array<i32>} : memref<1x1xf32, #tpu.memory_space<vmem>>, vector<1x1xf32>,
    return
  }
}

</mosaic_0001>

<bundles_post_ra>
// kernel: tpu_custom_call.1
= control target key start
LH: loop header
LB: loop body
LE: loop exit
PB: predicated region body
PF: predicated region fallthrough
CT: control target
= control target key end

     0   :  { %6 = vsyncpa [#allocation3], 0  ;;  %s282_s0 = inlined_call_operand.hbm [shape: f32[2,2048], index: 0, kind: input, shape index: {}]   ;;  %s283_s1 = inlined_call_operand.hbm [shape: f32[1,1], index: 1, kind: output, shape index: {}]  }
   0x1   :  { %7 = vsyncpa [#allocation4], 0  ;;  %s229_s6 = smov [#allocation2]   ;;  %s181_s10 = scalar_lea.hbm %s282_s0, 512 }
   0x2   :  { %s14_s7 = sshll.u32 %s229_s6, 4  ;;  %p182_p0 = scmp.ne.s32.totalorder %s282_s0, %s181_s10  ;;  %s15_s7 = int_to_ptr.vmem [resolvable:$true] %s14_s7 }
   0x3   :  { %p185_p1 = scmp.lt.u32.totalorder %s181_s10, %s282_s0 }
   0x5   :  { %p187_p2 = pnand %p185_p1, %p182_p0 }
   0x7   :  { %190 = shalt.err (!%p187_p2)
}
   0x8   :  { %s191_s15 = scalar_lea.vmem %s15_s7, 512  ;;  %p196_p4 = scmp.lt.s32.totalorder %s15_s7, %s15_s7 }
   0x9   :  { %p192_p3 = scmp.ne.s32.totalorder %s15_s7, %s191_s15  ;;  %p197_p5 = scmp.lt.s32.totalorder %s191_s15, %s191_s15 }
   0xb   :  { %p198_p6 = por %p197_p5, %p196_p4 }
   0xd   :  { %p199_p7 = pnand %p198_p6, %p192_p3 }
   0xf   :  { %202 = shalt.err (!%p199_p7)
}
  0x10   :  { %17 = dma.hbm_to_vmem [thread:$0]  %s282_s0, 512, %s15_s7, [#allocation3]  }
  0x11   :  { %225 = dma.done.wait [#allocation3], 512  }
  0x12   :  { %226 = vsyncadd [#allocation3], 4294966784  ;;  %v37_v0 = vlaneseq  ;;  %v230_v1 = vmov 1983009808   ;;  %v21_v6 = vld [vmem:[#allocation2] sm:$0xff]  ;;  %v22_v7 = vld [vmem:[#allocation2 + $0x8] sm:$0xff] }
  0x13   :  { %v35_v2 = vunpack.c.l.s4 %v230_v1  ;;  %v23_v8 = vld [vmem:[#allocation2 + $0x10] sm:$0xff]  ;;  %v24_v9 = vld [vmem:[#allocation2 + $0x18] sm:$0xff]  ;;  %v25_v10 = vand.u32 2147483647, %v21_v6  ;;  %v26_v11 = vand.u32 2147483647, %v22_v7 }
  0x14   :  { %v38_v3 = vshrl.u32 %v37_v0, 7  ;;  %v27_v12 = vand.u32 2147483647, %v23_v8  ;;  %v28_v13 = vand.u32 2147483647, %v24_v9  ;;  %vm117_vm0 = vcmask 1041408  }
  0x15   :  { %v36_v4 = vunpack.c.0.s8 %v35_v2  ;;  %v33_v14 = vcombine.high %v25_v10, %v25_v10  ;;  %v50_v16 = vcombine.high %v26_v11, %v26_v11  ;;  %s231_s0 = smov [#allocation5]   ;;  %vm159_vm1 = vcmask 0  }
  0x16   :  { %v67_v18 = vcombine.high %v27_v12, %v27_v12  ;;  %v84_v20 = vcombine.high %v28_v13, %v28_v13  ;;  %s167_s18 = sshll.u32 %s231_s0, 4  ;;  %s168_s18 = int_to_ptr.vmem [resolvable:$true] %s167_s18 }
  0x17   :  { %v39_v5 = vsub.s32 %v36_v4, %v38_v3  ;;  %s203_s20 = scalar_lea.vmem %s168_s18, 16  ;;  %s207_s21 = scalar_lea.vmem %s168_s18, 32 }
  0x18   :  { %p204_p8 = scmp.ne.s32.totalorder %s168_s18, %s203_s20  ;;  %p208_p9 = scmp.lt.s32.totalorder %s168_s18, %s168_s18 }
  0x19   :  { %v40_v15 = vrot.slane %v25_v10, %v39_v5  ;;  %v57_v17 = vrot.slane %v26_v11, %v39_v5  ;;  %v74_v19 = vrot.slane %v27_v12, %v39_v5  ;;  %v91_v21 = vrot.slane %v28_v13, %v39_v5  ;;  %p209_p10 = scmp.lt.s32.totalorder %s207_s21, %s203_s20 }
  0x1a   :  { %v47_v22 = vrot.slane %v33_v14, %v39_v5  ;;  %v64_v24 = vrot.slane %v50_v16, %v39_v5  ;;  %v81_v26 = vrot.slane %v67_v18, %v39_v5  ;;  %v98_v28 = vrot.slane %v84_v20, %v39_v5 }
  0x1b   :  { %v48_v23 = vcombine.high %v40_v15, %v40_v15  ;;  %v65_v25 = vcombine.high %v57_v17, %v57_v17  ;;  %v82_v27 = vcombine.high %v74_v19, %v74_v19  ;;  %v99_v29 = vcombine.high %v91_v21, %v91_v21  ;;  %p210_p11 = por %p209_p10, %p208_p9 }
  0x1c   :  { %v49_v30 = vcombine.high %v47_v22, %v47_v22  ;;  %v66_v31 = vcombine.high %v64_v24, %v64_v24  ;;  %v118_v32 = vsel %vm117_vm0, %v40_v15, -inf  ;;  %v83_v34 = vcombine.high %v81_v26, %v81_v26 }
  0x1d   :  { %v119_v33 = vsel %vm117_vm0, %v48_v23, -inf  ;;  %v100_v35 = vcombine.high %v98_v28, %v98_v28  ;;  %v120_v36 = vsel %vm117_vm0, %v47_v22, -inf  ;;  %v122_v37 = vsel %vm117_vm0, %v57_v17, -inf  ;;  %p211_p12 = pnand %p210_p11, %p204_p8 }
  0x1e   :  { %v121_v38 = vsel %vm117_vm0, %v49_v30, -inf  ;;  %v123_v39 = vmax.f32 %v118_v32, %v122_v37  ;;  %v124_v40 = vsel %vm117_vm0, %v65_v25, -inf  ;;  %v126_v41 = vsel %vm117_vm0, %v64_v24, -inf }
  0x1f   :  { %v125_v42 = vmax.f32 %v119_v33, %v124_v40  ;;  %v127_v43 = vmax.f32 %v120_v36, %v126_v41  ;;  %v128_v44 = vsel %vm117_vm0, %v66_v31, -inf  ;;  %v130_v45 = vsel %vm117_vm0, %v74_v19, -inf }
  0x20   :  { %v129_v46 = vmax.f32 %v121_v38, %v128_v44  ;;  %v131_v47 = vmax.f32 %v123_v39, %v130_v45  ;;  %v132_v48 = vsel %vm117_vm0, %v82_v27, -inf  ;;  %v134_v49 = vsel %vm117_vm0, %v81_v26, -inf }
  0x21   :  { %v133_v50 = vmax.f32 %v125_v42, %v132_v48  ;;  %v135_v51 = vmax.f32 %v127_v43, %v134_v49  ;;  %v136_v52 = vsel %vm117_vm0, %v83_v34, -inf  ;;  %v138_v53 = vsel %vm117_vm0, %v91_v21, -inf }
  0x22   :  { %v137_v54 = vmax.f32 %v129_v46, %v136_v52  ;;  %v139_v55 = vmax.f32 %v131_v47, %v138_v53  ;;  %v140_v56 = vsel %vm117_vm0, %v99_v29, -inf  ;;  %v142_v57 = vsel %vm117_vm0, %v98_v28, -inf }
  0x23   :  { %v141_v58 = vmax.f32 %v133_v50, %v140_v56  ;;  %v143_v59 = vmax.f32 %v135_v51, %v142_v57  ;;  %v144_v60 = vsel %vm117_vm0, %v100_v35, -inf }
  0x24   :  { %v145_v61 = vmax.f32 %v137_v54, %v144_v60 }
  0x25   :  { %v146_v62 = vmax.f32 %v139_v55, %v141_v58 }
  0x26   :  { %v147_v63 = vmax.f32 %v143_v59, %v145_v61 }
  0x28   :  { %v148_v0 = vmax.f32 %v146_v62, %v147_v63 }
  0x2a   :  { %149 = vmax.xlane.f32.xlu0 %v148_v0 }
  0xb7   :  { %v150_v1 = vpop.xlane.xlu0 %149 }
  0xb8   :  { %v151_v2 = vrot.slane %v150_v1, 4 }
  0xba   :  { %v152_v3 = vmax.f32 %v150_v1, %v151_v2 }
  0xbc   :  { %v153_v4 = vrot.slane %v152_v3, 2 }
  0xbe   :  { %v154_v5 = vmax.f32 %v152_v3, %v153_v4 }
  0xc0   :  { %v155_v6 = vrot.slane %v154_v5, 1 }
  0xc2   :  { %v156_v7 = vmax.f32 %v154_v5, %v155_v6 }
  0xc4   :  { %176 = vpush %v156_v7 }
  0xf5   :  { %s177_s19 = spop %176 }
  0xf6   :  { %v158_v8 = vstv %s177_s19 }
  0xf7   :  { %160 = vst.msk [vmem:[#allocation5] sm:$0x1] %vm159_vm1, %v158_v8 }
  0xf8   :  { %214 = shalt.err (!%p211_p12)
}
  0xf9   :  { %s215_s24 = scalar_lea.hbm %s283_s1, 16 }
  0xfa   :  { %p216_p13 = scmp.ne.s32.totalorder %s283_s1, %s215_s24  ;;  %p219_p0 = scmp.lt.u32.totalorder %s215_s24, %s283_s1 }
  0xfc   :  { %p221_p1 = pnand %p219_p0, %p216_p13 }
  0xfe   :  { %224 = shalt.err (!%p221_p1)
}
  0xff   :  { %170 = dma.vmem_to_hbm [thread:$0]  %s168_s18, 16, %s283_s1, [#allocation4]  }
 0x100   :  { %227 = dma.done.wait [#allocation4], 16  }
 0x101   :  { %228 = vsyncadd [#allocation4], 4294967280 }
 0x102   :  { %174 = vsyncpa [#allocation3], 1 }
 0x103   :  { %175 = vsyncpa [#allocation4], 1 }

</bundles_post_ra>
